<compile_context>
chip_gen: v7x
topology: tpu7x:2x2x1
jax: 0.10.0
libtpu: 0.0.40
codegen_flags: <defaults>
</compile_context>

<pallas_src>
import functools

import jax
import jax.numpy as jnp
from jax import lax
from jax.experimental import pallas as pl
from jax.experimental.pallas import tpu as pltpu


def _rmsnorm_kernel(x_ref, w_ref, o_ref, *, eps, inv_dim, use_mxu_reduce):
    # Hot path: upcast, square, mean-reduce over last dim, rsqrt, scale.
    x = x_ref[...].astype(jnp.float32)                      # x.float()
    xx = x * x
    if use_mxu_reduce:
        # Offload the sum-of-squares to the (idle) MXU: xx @ (ones * 1/dim).
        ones = jnp.full((x.shape[-1], 1), inv_dim, dtype=jnp.float32)
        ms = jnp.dot(xx, ones, preferred_element_type=jnp.float32)
    else:
        ms = jnp.mean(xx, axis=-1, keepdims=True)           # XLU reduce
    y = x * lax.rsqrt(ms + eps)                             # EUP rsqrt + VPU scale
    w = w_ref[...]                                          # (1, dim), single load
    # type_as(weight) -> weight dtype, then elementwise scale (one broadcast).
    o_ref[...] = (y.astype(w.dtype) * w).astype(o_ref.dtype)


def _tpu_vmem_bytes() -> int:
    """Physical VMEM per TensorCore; conservative (v7x-sized) if unknown."""
    try:
        return int(pltpu.get_tpu_info().vmem_capacity_bytes)
    except Exception:
        return 64 << 20  # safe everywhere (smaller tiles, still correct)


def _pick_row_tile(rows: int, dim: int, in_itemsize: int, out_itemsize: int,
                   vmem_bytes: int) -> int:
    """Largest dtype-aligned row tile that fits the per-generation VMEM budget."""
    # Packed sublane rows per vreg: f32 -> 8, bf16 -> 16, 8-bit -> 32.
    pack = max(8, 32 // max(in_itemsize, 1))
    small_vmem = vmem_bytes < (96 << 20)          # v7x-class: 64 MiB per TC
    num_cores = 2 if small_vmem else 1            # v7x: grid shards over 2 TCs
    # Honest per-row working set: double-buffered in + out tiles plus ~4
    # dim-wide f32 temporaries (x_f32, x*x, y, scaled y).
    per_row = 2 * dim * (in_itemsize + out_itemsize) + 4 * dim * 4
    budget = (22 << 20) if small_vmem else (52 << 20)
    max_tile = max(budget // max(per_row, 1), pack)
    rows_rounded = pl.cdiv(rows, pack) * pack
    tile = min(max_tile, rows_rounded)            # no artificial row cap
    # Keep enough grid steps for steady-state pipelining; on dual-core chips
    # give each TensorCore ~3 blocks so prologue DMA is not fully exposed.
    min_steps = 6 if num_cores == 2 else 4
    if rows > min_steps * pack:
        cap = max((pl.cdiv(rows, min_steps) // pack) * pack, pack)
        tile = min(tile, cap)
    return max((tile // pack) * pack, pack)


def rmsnorm(x: jax.Array, weight: jax.Array, eps: float = 1e-6,
            row_tile: int | None = None) -> jax.Array:
    """RMSNorm over the last axis of x. Returns array with weight's dtype."""
    orig_shape = x.shape
    dim = orig_shape[-1]
    assert weight.shape == (dim,)

    rows = 1
    for s in orig_shape[:-1]:
        rows *= s
    x2d = x.reshape(rows, dim)
    w2d = weight.reshape(1, dim)

    in_itemsize = jnp.dtype(x.dtype).itemsize
    out_itemsize = jnp.dtype(weight.dtype).itemsize

    vmem_bytes = _tpu_vmem_bytes()
    small_vmem = vmem_bytes < (96 << 20)          # v7x-class chip
    if row_tile is None:
        row_tile = _pick_row_tile(rows, dim, in_itemsize, out_itemsize, vmem_bytes)

    grid = pl.cdiv(rows, row_tile)  # ragged last block handled by Pallas

    # v7x's 3.2 TB/s HBM can make this VALU-bound; move the reduction adds to
    # the idle MXU there. Gated to lane-dense dims; neutral elsewhere.
    use_mxu_reduce = small_vmem and (dim % 128 == 0)

    # Scoped VMEM limit: honest tile working set + headroom, capped per
    # generation (<= ~100 MiB on 128 MiB chips, <= ~46 MiB on v7x's 64 MiB).
    tile_bytes = (2 * row_tile * dim * (in_itemsize + out_itemsize)
                  + 4 * row_tile * dim * 4
                  + 2 * dim * out_itemsize)
    vmem_cap = (46 << 20) if small_vmem else (100 << 20)
    vmem_limit = min(max(int(tile_bytes * 1.25) + (2 << 20), 32 << 20), vmem_cap)

    cost = pl.CostEstimate(
        flops=4 * rows * dim,
        transcendentals=rows,
        bytes_accessed=rows * dim * (in_itemsize + out_itemsize) + dim * out_itemsize,
    )

    kernel = functools.partial(_rmsnorm_kernel, eps=eps, inv_dim=1.0 / dim,
                               use_mxu_reduce=use_mxu_reduce)

    def call(weight_spec):
        return pl.pallas_call(
            kernel,
            out_shape=jax.ShapeDtypeStruct((rows, dim), weight.dtype),
            grid_spec=pltpu.PrefetchScalarGridSpec(
                num_scalar_prefetch=0,
                grid=(grid,),
                in_specs=[
                    pl.BlockSpec((row_tile, dim), lambda i: (i, 0)),
                    weight_spec,
                ],
                out_specs=pl.BlockSpec((row_tile, dim), lambda i: (i, 0)),
            ),
            compiler_params=pltpu.CompilerParams(
                dimension_semantics=("parallel",),
                vmem_limit_bytes=vmem_limit,
            ),
            cost_estimate=cost,
        )(x2d, w2d)

    try:
        # Weight block is grid-invariant (index map always (0, 0)):
        # single-buffer it so all VMEM goes to the row tile.
        out = call(pl.BlockSpec((1, dim), lambda i: (0, 0),
                                pipeline_mode=pl.Buffered(1)))
    except Exception:
        # Fallback for lowerings that reject single-buffering; the constant
        # index map already prevents per-step refetch, so this is near-neutral.
        out = call(pl.BlockSpec((1, dim), lambda i: (0, 0)))

    return out.reshape(orig_shape)


if __name__ == "__main__":
    key = jax.random.PRNGKey(0)
    batch, seq, hidden = 2, 8, 32

    kx, kw = jax.random.split(key, 2)
    # Input in bfloat16 to exercise the x.float() cast inside the kernel.
    x = jax.random.normal(kx, (batch, seq, hidden), dtype=jnp.float32).astype(
        jnp.bfloat16)
    # Module initializes weight to ones; perturb slightly so the scale path is
    # actually exercised numerically (still deterministic).
    weight = (jnp.ones((hidden,), dtype=jnp.float32)
              + 0.1 * jax.random.normal(kw, (hidden,), dtype=jnp.float32))

    out = rmsnorm(x, weight, eps=1e-6)
    out = jax.block_until_ready(out)

    # Reference check in plain JAX (same math as the PyTorch module).
    xf = x.astype(jnp.float32)
    ref = xf * lax.rsqrt(jnp.mean(xf * xf, axis=-1, keepdims=True) + 1e-6)
    ref = ref.astype(weight.dtype) * weight
    assert out.shape == (batch, seq, hidden)
    assert out.dtype == weight.dtype
    assert jnp.allclose(out, ref, atol=1e-5, rtol=1e-5)

    print("KERNEL_OK")
</pallas_src>

<mosaic_0001>
module attributes {stable_mosaic.version = 11 : i64} {
  func.func @_rmsnorm_kernel(%arg0: i32, %arg1: memref<16x32xbf16, #tpu.memory_space<vmem>>, %arg2: memref<1x32xf32, #tpu.memory_space<vmem>>, %arg3: memref<16x32xf32, #tpu.memory_space<vmem>>) attributes {dimension_semantics = [#tpu.dimension_semantics<parallel>], iteration_bounds = array<i64: 1>, scalar_prefetch = 0 : i64, scratch_operands = 0 : i64, tpu.core_type = #tpu.core_type<tc>, window_params = [{transform_indices = @transform_0, window_bounds = array<i64: 16, 32>}, {pipeline_mode = #tpu.pipeline_mode<synchronous>, transform_indices = @transform_1, window_bounds = array<i64: 1, 32>}, {transform_indices = @transform_2, window_bounds = array<i64: 16, 32>}]} {
    %c0 = arith.constant 0 : index
    %c0_0 = arith.constant 0 : index
    %0 = vector.load %arg1[%c0, %c0_0] : memref<16x32xbf16, #tpu.memory_space<vmem>>, vector<16x32xbf16>
    %1 = arith.extf %0 : vector<16x32xbf16> to vector<16x32xf32>
    %2 = arith.mulf %1, %1 : vector<16x32xf32>
    %cst = arith.constant dense<0.000000e+00> : vector<16xf32>
    %3 = vector.multi_reduction <add>, %2, %cst [1] : vector<16x32xf32> to vector<16xf32>
    %4 = vector.shape_cast %3 : vector<16xf32> to vector<16x1xf32>
    %cst_1 = arith.constant 3.200000e+01 : f32
    %5 = vector.broadcast %cst_1 : f32 to vector<16x1xf32>
    %6 = arith.divf %4, %5 : vector<16x1xf32>
    %cst_2 = arith.constant 9.99999997E-7 : f32
    %7 = vector.broadcast %cst_2 : f32 to vector<16x1xf32>
    %8 = arith.addf %6, %7 : vector<16x1xf32>
    %9 = math.rsqrt %8 : vector<16x1xf32>
    %10 = vector.broadcast %9 : vector<16x1xf32> to vector<16x32xf32>
    %11 = arith.mulf %1, %10 : vector<16x32xf32>
    %c0_3 = arith.constant 0 : index
    %c0_4 = arith.constant 0 : index
    %12 = vector.load %arg2[%c0_3, %c0_4] : memref<1x32xf32, #tpu.memory_space<vmem>>, vector<1x32xf32>
    %13 = vector.broadcast %12 : vector<1x32xf32> to vector<16x32xf32>
    %14 = arith.mulf %11, %13 : vector<16x32xf32>
    %c0_5 = arith.constant 0 : index
    %c0_6 = arith.constant 0 : index
    %15 = vector.load %arg3[%c0_5, %c0_6] : memref<16x32xf32, #tpu.memory_space<vmem>>, vector<16x32xf32>
    tpu.vector_store %arg3[%c0_5, %c0_6], %14 {strides = array<i32>} : memref<16x32xf32, #tpu.memory_space<vmem>>, vector<16x32xf32>,
    return
  }
  func.func @transform_0(%arg0: i32) -> (i32, i32) {
    %c0_i32 = arith.constant 0 : i32
    %c0_i32_0 = arith.constant 0 : i32
    return %arg0, %c0_i32 : i32, i32
  }
  func.func @transform_1(%arg0: i32) -> (i32, i32) {
    %c0_i32 = arith.constant 0 : i32
    %c0_i32_0 = arith.constant 0 : i32
    %c0_i32_1 = arith.constant 0 : i32
    return %c0_i32, %c0_i32_0 : i32, i32
  }
  func.func @transform_2(%arg0: i32) -> (i32, i32) {
    %c0_i32 = arith.constant 0 : i32
    %c0_i32_0 = arith.constant 0 : i32
    return %arg0, %c0_i32 : i32, i32
  }
}

module attributes {stable_mosaic.version = 11 : i64} {
  func.func @_rmsnorm_kernel(%arg0: i32, %arg1: memref<16x32xbf16, #tpu.memory_space<vmem>>, %arg2: memref<1x32xf32, #tpu.memory_space<vmem>>, %arg3: memref<16x32xf32, #tpu.memory_space<vmem>>) attributes {dimension_semantics = [#tpu.dimension_semantics<parallel>], iteration_bounds = array<i64: 1>, scalar_prefetch = 0 : i64, scratch_operands = 0 : i64, tpu.core_type = #tpu.core_type<tc>, window_params = [{transform_indices = @transform_0, window_bounds = array<i64: 16, 32>}, {pipeline_mode = #tpu.pipeline_mode<synchronous>, transform_indices = @transform_1, window_bounds = array<i64: 1, 32>}, {transform_indices = @transform_2, window_bounds = array<i64: 16, 32>}]} {
    %c0 = arith.constant 0 : index
    %c0_0 = arith.constant 0 : index
    %0 = vector.load %arg1[%c0, %c0_0] : memref<16x32xbf16, #tpu.memory_space<vmem>>, vector<16x32xbf16>
    %1 = arith.extf %0 : vector<16x32xbf16> to vector<16x32xf32>
    %2 = arith.mulf %1, %1 : vector<16x32xf32>
    %cst = arith.constant dense<0.000000e+00> : vector<16xf32>
    %3 = vector.multi_reduction <add>, %2, %cst [1] : vector<16x32xf32> to vector<16xf32>
    %4 = vector.shape_cast %3 : vector<16xf32> to vector<16x1xf32>
    %cst_1 = arith.constant 3.200000e+01 : f32
    %5 = vector.broadcast %cst_1 : f32 to vector<16x1xf32>
    %6 = arith.divf %4, %5 : vector<16x1xf32>
    %cst_2 = arith.constant 9.99999997E-7 : f32
    %7 = vector.broadcast %cst_2 : f32 to vector<16x1xf32>
    %8 = arith.addf %6, %7 : vector<16x1xf32>
    %9 = math.rsqrt %8 : vector<16x1xf32>
    %10 = vector.broadcast %9 : vector<16x1xf32> to vector<16x32xf32>
    %11 = arith.mulf %1, %10 : vector<16x32xf32>
    %c0_3 = arith.constant 0 : index
    %c0_4 = arith.constant 0 : index
    %12 = vector.load %arg2[%c0_3, %c0_4] : memref<1x32xf32, #tpu.memory_space<vmem>>, vector<1x32xf32>
    %13 = vector.broadcast %12 : vector<1x32xf32> to vector<16x32xf32>
    %14 = arith.mulf %11, %13 : vector<16x32xf32>
    %c0_5 = arith.constant 0 : index
    %c0_6 = arith.constant 0 : index
    %15 = vector.load %arg3[%c0_5, %c0_6] : memref<16x32xf32, #tpu.memory_space<vmem>>, vector<16x32xf32>
    tpu.vector_store %arg3[%c0_5, %c0_6], %14 {strides = array<i32>} : memref<16x32xf32, #tpu.memory_space<vmem>>, vector<16x32xf32>,
    return
  }
  func.func @transform_0(%arg0: i32) -> (i32, i32) {
    %c0_i32 = arith.constant 0 : i32
    %c0_i32_0 = arith.constant 0 : i32
    return %arg0, %c0_i32 : i32, i32
  }
  func.func @transform_1(%arg0: i32) -> (i32, i32) {
    %c0_i32 = arith.constant 0 : i32
    %c0_i32_0 = arith.constant 0 : i32
    %c0_i32_1 = arith.constant 0 : i32
    return %c0_i32, %c0_i32_0 : i32, i32
  }
  func.func @transform_2(%arg0: i32) -> (i32, i32) {
    %c0_i32 = arith.constant 0 : i32
    %c0_i32_0 = arith.constant 0 : i32
    return %arg0, %c0_i32 : i32, i32
  }
}

</mosaic_0001>

<bundles_post_ra>
// kernel: tpu_custom_call.1
= control target key start
LH: loop header
LB: loop body
LE: loop exit
PB: predicated region body
PF: predicated region fallthrough
CT: control target
= control target key end

     0   :  { %7 = vsyncpa [#allocation3], 0  ;;  %s191_s0 = inlined_call_operand.hbm [shape: bf16[16,32], index: 0, kind: input, shape index: {}]   ;;  %s192_s1 = inlined_call_operand.vmem [shape: f32[1,32], index: 1, kind: input, shape index: {}]   ;;  %s193_s2 = inlined_call_operand.hbm [shape: f32[16,32], index: 2, kind: output, shape index: {}]  }
   0x1   :  { %8 = vsyncpa [#allocation4], 0  ;;  %s139_s9 = smov [#allocation2]   ;;  %s91_s13 = scalar_lea.hbm %s191_s0, 128 }
   0x2   :  { %s14_s10 = sshll.u32 %s139_s9, 4  ;;  %p92_p0 = scmp.ne.s32.totalorder %s191_s0, %s91_s13  ;;  %s15_s10 = int_to_ptr.vmem [resolvable:$true] %s14_s10 }
   0x3   :  { %p95_p1 = scmp.lt.u32.totalorder %s91_s13, %s191_s0 }
   0x5   :  { %p97_p2 = pnand %p95_p1, %p92_p0 }
   0x7   :  { %100 = shalt.err (!%p97_p2)
}
   0x8   :  { %s101_s18 = scalar_lea.vmem %s15_s10, 128  ;;  %p106_p4 = scmp.lt.s32.totalorder %s15_s10, %s15_s10 }
   0x9   :  { %p102_p3 = scmp.ne.s32.totalorder %s15_s10, %s101_s18  ;;  %p107_p5 = scmp.lt.s32.totalorder %s101_s18, %s101_s18 }
   0xb   :  { %p108_p6 = por %p107_p5, %p106_p4 }
   0xd   :  { %p109_p7 = pnand %p108_p6, %p102_p3 }
   0xf   :  { %112 = shalt.err (!%p109_p7)
}
  0x10   :  { %s140_s19 = smov 64   ;;  %s141_s20 = smov 4  }
  0x11   :  { %20 = dma.hbm_to_vmem [thread:$0]  %s191_s0, 128, %s15_s10, [#allocation3], %s140_s19, %s140_s19, %s141_s20  }
  0x12   :  { %135 = dma.done.wait [#allocation3], 128  }
  0x13   :  { %136 = vsyncadd [#allocation3], 4294967168  ;;  %v78_v0 = vld [vmem:[#allocation2] sm:$0xff]   ;;  %vm32_vm0 = vcmask 261120   ;;  %s142_s24 = smov [#allocation5]  }
  0x14   :  { %v79_v1 = vunpack.c.l.bf16 %v78_v0  ;;  %v80_v2 = vunpack.c.h.bf16 %v78_v0  ;;  %v76_v14 = vld [vmem:[%s192_s1] ss:$0 sm:$0xff]  ;;  %s64_s25 = sshll.u32 %s142_s24, 4  ;;  %s65_s25 = int_to_ptr.vmem [resolvable:$true] %s64_s25 }
  0x15   :  { %s113_s26 = scalar_lea.vmem %s65_s25, 256  ;;  %p118_p9 = scmp.lt.s32.totalorder %s65_s25, %s65_s25 }
  0x16   :  { %v30_v3 = vmul.f32 %v79_v1, %v79_v1  ;;  %v31_v4 = vmul.f32 %v80_v2, %v80_v2  ;;  %p114_p8 = scmp.ne.s32.totalorder %s65_s25, %s113_s26  ;;  %p119_p10 = scmp.lt.s32.totalorder %s113_s26, %s113_s26 }
  0x18   :  { %v33_v5 = vsel %vm32_vm0, %v30_v3, 0.0  ;;  %v36_v6 = vsel %vm32_vm0, %v31_v4, 0.0  ;;  %p120_p11 = por %p119_p10, %p118_p9 }
  0x19   :  { %34 = vadd.xlane.f32.xlu0 %v33_v5 }
  0x1a   :  { %p121_p12 = pnand %p120_p11, %p114_p8 }
  0x1d   :  { %37 = vadd.xlane.f32.xlu0 %v36_v6 }
  0xa6   :  { %v35_v7 = vpop.xlane.xlu0 %34 }
  0xa7   :  { %v40_v8 = vmul.f32 0.03125, %v35_v7 }
  0xa9   :  { %v42_v9 = vadd.f32 1e-06, %v40_v8 }
  0xaa   :  { %v38_v10 = vpop.xlane.xlu0 %37 }
  0xab   :  { %87 = vrsqrt.f32 %v42_v9  ;;  %v41_v11 = vmul.f32 0.03125, %v38_v10 }
  0xad   :  { %v43_v12 = vadd.f32 1e-06, %v41_v11 }
  0xaf   :  { %89 = vrsqrt.f32 %v43_v12 }
  0xb5   :  { %v88_v13 = vpop.eup %87 }
  0xb6   :  { %v46_v15 = vmul.f32 %v88_v13, %v79_v1 }
  0xb8   :  { %v55_v16 = vmul.f32 %v76_v14, %v46_v15 }
  0xb9   :  { %v90_v17 = vpop.eup %89 }
  0xba   :  { %v47_v18 = vmul.f32 %v90_v17, %v80_v2  ;;  %57 = vst.msk [vmem:[#allocation5] sm:$0xff] %vm32_vm0, %v55_v16 }
  0xbc   :  { %v56_v19 = vmul.f32 %v76_v14, %v47_v18 }
  0xbe   :  { %58 = vst.msk [vmem:[#allocation5 + $0x8] sm:$0xff] %vm32_vm0, %v56_v19 }
  0xbf   :  { %124 = shalt.err (!%p121_p12)
}
  0xc0   :  { %s125_s28 = scalar_lea.hbm %s193_s2, 256 }
  0xc1   :  { %p126_p13 = scmp.ne.s32.totalorder %s193_s2, %s125_s28  ;;  %p129_p0 = scmp.lt.u32.totalorder %s125_s28, %s193_s2 }
  0xc3   :  { %p131_p1 = pnand %p129_p0, %p126_p13 }
  0xc5   :  { %134 = shalt.err (!%p131_p1)
}
  0xc6   :  { %s143_s5 = smov 128   ;;  %s144_s6 = smov 8  }
  0xc7   :  { %70 = dma.vmem_to_hbm [thread:$0]  %s65_s25, 256, %s193_s2, [#allocation4], %s143_s5, %s143_s5, %s144_s6  }
  0xc8   :  { %137 = dma.done.wait [#allocation4], 256  }
  0xc9   :  { %138 = vsyncadd [#allocation4], 4294967040 }
  0xca   :  { %74 = vsyncpa [#allocation3], 1 }
  0xcb   :  { %75 = vsyncpa [#allocation4], 1 }

// kernel: tpu_custom_call.1
= control target key start
LH: loop header
LB: loop body
LE: loop exit
PB: predicated region body
PF: predicated region fallthrough
CT: control target
= control target key end

     0   :  { %7 = vsyncpa [#allocation3], 0  ;;  %s191_s0 = inlined_call_operand.hbm [shape: bf16[16,32], index: 0, kind: input, shape index: {}]   ;;  %s192_s1 = inlined_call_operand.vmem [shape: f32[1,32], index: 1, kind: input, shape index: {}]   ;;  %s193_s2 = inlined_call_operand.hbm [shape: f32[16,32], index: 2, kind: output, shape index: {}]  }
   0x1   :  { %8 = vsyncpa [#allocation4], 0  ;;  %s139_s9 = smov [#allocation2]   ;;  %s91_s13 = scalar_lea.hbm %s191_s0, 128 }
   0x2   :  { %s14_s10 = sshll.u32 %s139_s9, 4  ;;  %p92_p0 = scmp.ne.s32.totalorder %s191_s0, %s91_s13  ;;  %s15_s10 = int_to_ptr.vmem [resolvable:$true] %s14_s10 }
   0x3   :  { %p95_p1 = scmp.lt.u32.totalorder %s91_s13, %s191_s0 }
   0x5   :  { %p97_p2 = pnand %p95_p1, %p92_p0 }
   0x7   :  { %100 = shalt.err (!%p97_p2)
}
   0x8   :  { %s101_s18 = scalar_lea.vmem %s15_s10, 128  ;;  %p106_p4 = scmp.lt.s32.totalorder %s15_s10, %s15_s10 }
   0x9   :  { %p102_p3 = scmp.ne.s32.totalorder %s15_s10, %s101_s18  ;;  %p107_p5 = scmp.lt.s32.totalorder %s101_s18, %s101_s18 }
   0xb   :  { %p108_p6 = por %p107_p5, %p106_p4 }
   0xd   :  { %p109_p7 = pnand %p108_p6, %p102_p3 }
   0xf   :  { %112 = shalt.err (!%p109_p7)
}
  0x10   :  { %s140_s19 = smov 64   ;;  %s141_s20 = smov 4  }
  0x11   :  { %20 = dma.hbm_to_vmem [thread:$0]  %s191_s0, 128, %s15_s10, [#allocation3], %s140_s19, %s140_s19, %s141_s20  }
  0x12   :  { %135 = dma.done.wait [#allocation3], 128  }
  0x13   :  { %136 = vsyncadd [#allocation3], 4294967168  ;;  %v78_v0 = vld [vmem:[#allocation2] sm:$0xff]   ;;  %vm32_vm0 = vcmask 261120   ;;  %s142_s24 = smov [#allocation5]  }
  0x14   :  { %v79_v1 = vunpack.c.l.bf16 %v78_v0  ;;  %v80_v2 = vunpack.c.h.bf16 %v78_v0  ;;  %v76_v14 = vld [vmem:[%s192_s1] ss:$0 sm:$0xff]  ;;  %s64_s25 = sshll.u32 %s142_s24, 4  ;;  %s65_s25 = int_to_ptr.vmem [resolvable:$true] %s64_s25 }
  0x15   :  { %s113_s26 = scalar_lea.vmem %s65_s25, 256  ;;  %p118_p9 = scmp.lt.s32.totalorder %s65_s25, %s65_s25 }
  0x16   :  { %v30_v3 = vmul.f32 %v79_v1, %v79_v1  ;;  %v31_v4 = vmul.f32 %v80_v2, %v80_v2  ;;  %p114_p8 = scmp.ne.s32.totalorder %s65_s25, %s113_s26  ;;  %p119_p10 = scmp.lt.s32.totalorder %s113_s26, %s113_s26 }
  0x18   :  { %v33_v5 = vsel %vm32_vm0, %v30_v3, 0.0  ;;  %v36_v6 = vsel %vm32_vm0, %v31_v4, 0.0  ;;  %p120_p11 = por %p119_p10, %p118_p9 }
  0x19   :  { %34 = vadd.xlane.f32.xlu0 %v33_v5 }
  0x1a   :  { %p121_p12 = pnand %p120_p11, %p114_p8 }
  0x1d   :  { %37 = vadd.xlane.f32.xlu0 %v36_v6 }
  0xa6   :  { %v35_v7 = vpop.xlane.xlu0 %34 }
  0xa7   :  { %v40_v8 = vmul.f32 0.03125, %v35_v7 }
  0xa9   :  { %v42_v9 = vadd.f32 1e-06, %v40_v8 }
  0xaa   :  { %v38_v10 = vpop.xlane.xlu0 %37 }
  0xab   :  { %87 = vrsqrt.f32 %v42_v9  ;;  %v41_v11 = vmul.f32 0.03125, %v38_v10 }
  0xad   :  { %v43_v12 = vadd.f32 1e-06, %v41_v11 }
  0xaf   :  { %89 = vrsqrt.f32 %v43_v12 }
  0xb5   :  { %v88_v13 = vpop.eup %87 }
  0xb6   :  { %v46_v15 = vmul.f32 %v88_v13, %v79_v1 }
  0xb8   :  { %v55_v16 = vmul.f32 %v76_v14, %v46_v15 }
  0xb9   :  { %v90_v17 = vpop.eup %89 }
  0xba   :  { %v47_v18 = vmul.f32 %v90_v17, %v80_v2  ;;  %57 = vst.msk [vmem:[#allocation5] sm:$0xff] %vm32_vm0, %v55_v16 }
  0xbc   :  { %v56_v19 = vmul.f32 %v76_v14, %v47_v18 }
  0xbe   :  { %58 = vst.msk [vmem:[#allocation5 + $0x8] sm:$0xff] %vm32_vm0, %v56_v19 }
  0xbf   :  { %124 = shalt.err (!%p121_p12)
}
  0xc0   :  { %s125_s28 = scalar_lea.hbm %s193_s2, 256 }
  0xc1   :  { %p126_p13 = scmp.ne.s32.totalorder %s193_s2, %s125_s28  ;;  %p129_p0 = scmp.lt.u32.totalorder %s125_s28, %s193_s2 }
  0xc3   :  { %p131_p1 = pnand %p129_p0, %p126_p13 }
  0xc5   :  { %134 = shalt.err (!%p131_p1)
}
  0xc6   :  { %s143_s5 = smov 128   ;;  %s144_s6 = smov 8  }
  0xc7   :  { %70 = dma.vmem_to_hbm [thread:$0]  %s65_s25, 256, %s193_s2, [#allocation4], %s143_s5, %s143_s5, %s144_s6  }
  0xc8   :  { %137 = dma.done.wait [#allocation4], 256  }
  0xc9   :  { %138 = vsyncadd [#allocation4], 4294967040 }
  0xca   :  { %74 = vsyncpa [#allocation3], 1 }
  0xcb   :  { %75 = vsyncpa [#allocation4], 1 }

</bundles_post_ra>
